<compile_context>
chip_gen: v7x
topology: tpu7x:2x2x1
jax: 0.10.0
libtpu: 0.0.40
codegen_flags: <defaults>
</compile_context>

<pallas_src>
import functools

import jax
import jax.numpy as jnp
from jax import lax
from jax.experimental import pallas as pl
from jax.experimental.pallas import tpu as pltpu


def _lift_kernel(b_ref, x_ref, mt_ref, hs_ref, h_acc, *, num_ranks, feat):
    """Accumulate H = B^T @ x over N-tiles; at the end emit H_s[:, r*F:(r+1)*F] = M[r] * H."""
    i = pl.program_id(0)

    @pl.when(i == 0)
    def _():
        h_acc[...] = jnp.zeros_like(h_acc)

    # Contract the node axis (dim 0) of both tiles: partial (E, F) hyperedge features.
    h_acc[...] += lax.dot_general(
        b_ref[...], x_ref[...],
        dimension_numbers=(((0,), (0,)), ((), ())),
        preferred_element_type=jnp.float32)

    @pl.when(i == pl.num_programs(0) - 1)
    def _():
        h = h_acc[...]
        for r in range(num_ranks):  # static unroll; R is small
            hs_ref[:, r * feat:(r + 1) * feat] = h * mt_ref[:, r:r + 1]


def _seq_kernel(b_ref, hs_ref, x_ref, out_ref, *, num_ranks, feat):
    """One fused matmul per N-tile: S_tile = B_tile @ H_s; last rank slot := x_tile."""
    s = jnp.dot(b_ref[...], hs_ref[...], preferred_element_type=jnp.float32)
    out_ref[...] = s.astype(out_ref.dtype)                              # lane-dense store
    out_ref[:, (num_ranks - 1) * feat:] = x_ref[...].astype(out_ref.dtype)


def sequencer_rank_forward(x, incidence, rank_masks, he_idxs, *, tn=None):
    """SequencerRank.forward, feature_lifting='sum'. Returns (N, R, F)."""
    n, f = x.shape
    e = incidence.shape[1]
    m_sel = rank_masks[:, he_idxs]                       # glue: mask-column gather
    r = m_sel.shape[0]
    mt = m_sel.T.astype(jnp.float32)                     # (E, R), tiny
    b = incidence.astype(jnp.float32)                    # (N, E) densified incidence
    x32 = x.astype(jnp.float32)

    if tn is None:
        tn = n if n <= 512 else 512                      # big tiles ~HBM roofline
    if n % tn != 0:
        tn = n                                           # TODO(synk): pad N for ragged node-tile counts
    grid = (n // tn,)

    # Stage 1: scaled hyperedge-feature slab H_s (E, R*F), masks applied on the H side.
    hs = pl.pallas_call(
        functools.partial(_lift_kernel, num_ranks=r, feat=f),
        out_shape=jax.ShapeDtypeStruct((e, r * f), jnp.float32),
        grid_spec=pltpu.PrefetchScalarGridSpec(
            num_scalar_prefetch=0,
            grid=grid,
            in_specs=[
                pl.BlockSpec((tn, e), lambda i: (i, 0)),     # B node-tile
                pl.BlockSpec((tn, f), lambda i: (i, 0)),     # x node-tile
                pl.BlockSpec((e, r), lambda i: (0, 0)),      # M^T (grid-invariant)
            ],
            out_specs=pl.BlockSpec((e, r * f), lambda i: (0, 0)),
            scratch_shapes=[pltpu.VMEM((e, f), jnp.float32)],
        ),
        compiler_params=pltpu.CompilerParams(
            dimension_semantics=("arbitrary",)),             # N-reduction axis
    )(b, x32, mt)

    # Stage 2: S = B @ H_s tiled over N — data-parallel axis (v7x megacore-able).
    seq = pl.pallas_call(
        functools.partial(_seq_kernel, num_ranks=r, feat=f),
        out_shape=jax.ShapeDtypeStruct((n, r * f), jnp.float32),
        grid_spec=pltpu.PrefetchScalarGridSpec(
            num_scalar_prefetch=0,
            grid=grid,
            in_specs=[
                pl.BlockSpec((tn, e), lambda i: (i, 0)),       # B node-tile
                pl.BlockSpec((e, r * f), lambda i: (0, 0)),    # H_s (grid-invariant)
                pl.BlockSpec((tn, f), lambda i: (i, 0)),       # x node-tile
            ],
            out_specs=pl.BlockSpec((tn, r * f), lambda i: (i, 0)),
        ),
        compiler_params=pltpu.CompilerParams(
            dimension_semantics=("parallel",)),
    )(b, hs, x32)

    return seq.reshape(n, r, f)                              # free reshape, no transpose copy


def get_rank_masks(incidence, num_ranks):
    # Deterministic synthetic stand-in for topomamba's get_rank_masks:
    # a hyperedge's rank = (#incident nodes) mod num_ranks.
    col = jnp.sum(incidence, axis=0).astype(jnp.int32)
    rank_of_edge = col % num_ranks
    return (jnp.arange(num_ranks)[:, None] == rank_of_edge[None, :]).astype(jnp.float32)


def reference_forward(x, incidence, rank_masks, he_idxs):
    m = rank_masks[:, he_idxs]
    h = incidence.T @ x
    rf = jnp.einsum('ij,jk->jik', m, h)                   # (E, R, F)
    s = incidence @ rf.reshape(rf.shape[0], -1)           # (N, R*F)
    s = s.reshape(x.shape[0], -1, rf.shape[2])            # (N, R, F)
    return s.at[:, -1, :].set(x)


if __name__ == "__main__":
    N, E, F, R = 256, 128, 32, 4
    key = jax.random.PRNGKey(0)
    kx, kb = jax.random.split(key)
    x = jax.random.normal(kx, (N, F), dtype=jnp.float32)
    incidence = (jax.random.uniform(kb, (N, E)) < 0.4).astype(jnp.float32)
    rank_masks = get_rank_masks(incidence, R)             # deterministic "parameter"
    he_idxs = jnp.arange(E)[::-1]                         # deterministic hyperedge ids

    # tn=128 so both kernels actually exercise multi-tile grids at this size.
    out = sequencer_rank_forward(x, incidence, rank_masks, he_idxs, tn=128)
    out = jax.block_until_ready(out)

    ref = reference_forward(x, incidence, rank_masks, he_idxs)
    assert out.shape == (N, R, F)
    assert jnp.allclose(out, ref, atol=1e-3, rtol=1e-4), \
        float(jnp.max(jnp.abs(out - ref)))
    print("KERNEL_OK")
</pallas_src>

<mosaic_0001>
module attributes {stable_mosaic.version = 11 : i64} {
  func.func @_lift_kernel(%arg0: i32, %arg1: memref<128x128xf32, #tpu.memory_space<vmem>>, %arg2: memref<128x32xf32, #tpu.memory_space<vmem>>, %arg3: memref<128x4xf32, #tpu.memory_space<vmem>>, %arg4: memref<128x128xf32, #tpu.memory_space<vmem>>, %arg5: memref<128x32xf32, #tpu.memory_space<vmem>>) attributes {dimension_semantics = [#tpu.dimension_semantics<arbitrary>], iteration_bounds = array<i64: 2>, scalar_prefetch = 0 : i64, scratch_operands = 1 : i64, tpu.core_type = #tpu.core_type<tc>, window_params = [{transform_indices = @transform_0, window_bounds = array<i64: 128, 128>}, {transform_indices = @transform_1, window_bounds = array<i64: 128, 32>}, {pipeline_mode = #tpu.pipeline_mode<synchronous>, transform_indices = @transform_2, window_bounds = array<i64: 128, 4>}, {pipeline_mode = #tpu.pipeline_mode<synchronous>, transform_indices = @transform_3, window_bounds = array<i64: 128, 128>}]} {
    %c0_i32 = arith.constant 0 : i32
    %0 = arith.cmpi eq, %arg0, %c0_i32 : i32
    %1 = arith.extui %0 : i1 to i32
    %c0_i32_0 = arith.constant 0 : i32
    %2 = arith.cmpi ne, %1, %c0_i32_0 : i32
    scf.if %2 {
      %cst_9 = arith.constant 0.000000e+00 : f32
      %12 = vector.broadcast %cst_9 : f32 to vector<128x32xf32>
      %c0_10 = arith.constant 0 : index
      %c0_11 = arith.constant 0 : index
      %13 = vector.load %arg5[%c0_10, %c0_11] : memref<128x32xf32, #tpu.memory_space<vmem>>, vector<128x32xf32>
      tpu.vector_store %arg5[%c0_10, %c0_11], %12 {strides = array<i32>} : memref<128x32xf32, #tpu.memory_space<vmem>>, vector<128x32xf32>,
    } else {
    }
    %c0 = arith.constant 0 : index
    %c0_1 = arith.constant 0 : index
    %3 = vector.load %arg5[%c0, %c0_1] : memref<128x32xf32, #tpu.memory_space<vmem>>, vector<128x32xf32>
    %c0_2 = arith.constant 0 : index
    %c0_3 = arith.constant 0 : index
    %4 = vector.load %arg1[%c0_2, %c0_3] : memref<128x128xf32, #tpu.memory_space<vmem>>, vector<128x128xf32>
    %c0_4 = arith.constant 0 : index
    %c0_5 = arith.constant 0 : index
    %5 = vector.load %arg2[%c0_4, %c0_5] : memref<128x32xf32, #tpu.memory_space<vmem>>, vector<128x32xf32>
    %cst = arith.constant dense<0.000000e+00> : vector<128x32xf32>
    %6 = tpu.matmul %4, %5, %cst {dimension_numbers = #tpu.dot_dimension_numbers<[0], [0], [1], [1], [0, 1, 1, 1], [], []>} : vector<128x128xf32>, vector<128x32xf32>, vector<128x32xf32> -> vector<128x32xf32>
    %7 = arith.addf %3, %6 : vector<128x32xf32>
    %c0_6 = arith.constant 0 : index
    %c0_7 = arith.constant 0 : index
    %8 = vector.load %arg5[%c0_6, %c0_7] : memref<128x32xf32, #tpu.memory_space<vmem>>, vector<128x32xf32>
    tpu.vector_store %arg5[%c0_6, %c0_7], %7 {strides = array<i32>} : memref<128x32xf32, #tpu.memory_space<vmem>>, vector<128x32xf32>,
    %c1_i32 = arith.constant 1 : i32
    %9 = arith.cmpi eq, %arg0, %c1_i32 : i32
    %10 = arith.extui %9 : i1 to i32
    %c0_i32_8 = arith.constant 0 : i32
    %11 = arith.cmpi ne, %10, %c0_i32_8 : i32
    scf.if %11 {
      %c0_9 = arith.constant 0 : index
      %c0_10 = arith.constant 0 : index
      %12 = vector.load %arg5[%c0_9, %c0_10] : memref<128x32xf32, #tpu.memory_space<vmem>>, vector<128x32xf32>
      %c0_11 = arith.constant 0 : index
      %c0_12 = arith.constant 0 : index
      %13 = vector.load %arg3[%c0_11, %c0_12] : memref<128x4xf32, #tpu.memory_space<vmem>>, vector<128x1xf32>
      %14 = vector.broadcast %13 : vector<128x1xf32> to vector<128x32xf32>
      %15 = arith.mulf %12, %14 : vector<128x32xf32>
      %c0_13 = arith.constant 0 : index
      %c0_14 = arith.constant 0 : index
      %16 = vector.load %arg4[%c0_13, %c0_14] : memref<128x128xf32, #tpu.memory_space<vmem>>, vector<128x32xf32>
      tpu.vector_store %arg4[%c0_13, %c0_14], %15 {strides = array<i32>} : memref<128x128xf32, #tpu.memory_space<vmem>>, vector<128x32xf32>,
      %c0_15 = arith.constant 0 : index
      %c1 = arith.constant 1 : index
      %17 = vector.load %arg3[%c0_15, %c1] : memref<128x4xf32, #tpu.memory_space<vmem>>, vector<128x1xf32>
      %18 = vector.broadcast %17 : vector<128x1xf32> to vector<128x32xf32>
      %19 = arith.mulf %12, %18 : vector<128x32xf32>
      %c0_16 = arith.constant 0 : index
      %c32 = arith.constant 32 : index
      %20 = vector.load %arg4[%c0_16, %c32] : memref<128x128xf32, #tpu.memory_space<vmem>>, vector<128x32xf32>
      tpu.vector_store %arg4[%c0_16, %c32], %19 {strides = array<i32>} : memref<128x128xf32, #tpu.memory_space<vmem>>, vector<128x32xf32>,
      %c0_17 = arith.constant 0 : index
      %c2 = arith.constant 2 : index
      %21 = vector.load %arg3[%c0_17, %c2] : memref<128x4xf32, #tpu.memory_space<vmem>>, vector<128x1xf32>
      %22 = vector.broadcast %21 : vector<128x1xf32> to vector<128x32xf32>
      %23 = arith.mulf %12, %22 : vector<128x32xf32>
      %c0_18 = arith.constant 0 : index
      %c64 = arith.constant 64 : index
      %24 = vector.load %arg4[%c0_18, %c64] : memref<128x128xf32, #tpu.memory_space<vmem>>, vector<128x32xf32>
      tpu.vector_store %arg4[%c0_18, %c64], %23 {strides = array<i32>} : memref<128x128xf32, #tpu.memory_space<vmem>>, vector<128x32xf32>,
      %c0_19 = arith.constant 0 : index
      %c3 = arith.constant 3 : index
      %25 = vector.load %arg3[%c0_19, %c3] : memref<128x4xf32, #tpu.memory_space<vmem>>, vector<128x1xf32>
      %26 = vector.broadcast %25 : vector<128x1xf32> to vector<128x32xf32>
      %27 = arith.mulf %12, %26 : vector<128x32xf32>
      %c0_20 = arith.constant 0 : index
      %c96 = arith.constant 96 : index
      %28 = vector.load %arg4[%c0_20, %c96] : memref<128x128xf32, #tpu.memory_space<vmem>>, vector<128x32xf32>
      tpu.vector_store %arg4[%c0_20, %c96], %27 {strides = array<i32>} : memref<128x128xf32, #tpu.memory_space<vmem>>, vector<128x32xf32>,
    } else {
    }
    return
  }
  func.func @transform_0(%arg0: i32) -> (i32, i32) {
    %c0_i32 = arith.constant 0 : i32
    %c0_i32_0 = arith.constant 0 : i32
    return %arg0, %c0_i32 : i32, i32
  }
  func.func @transform_1(%arg0: i32) -> (i32, i32) {
    %c0_i32 = arith.constant 0 : i32
    %c0_i32_0 = arith.constant 0 : i32
    return %arg0, %c0_i32 : i32, i32
  }
  func.func @transform_2(%arg0: i32) -> (i32, i32) {
    %c0_i32 = arith.constant 0 : i32
    %c0_i32_0 = arith.constant 0 : i32
    %c0_i32_1 = arith.constant 0 : i32
    return %c0_i32, %c0_i32_0 : i32, i32
  }
  func.func @transform_3(%arg0: i32) -> (i32, i32) {
    %c0_i32 = arith.constant 0 : i32
    %c0_i32_0 = arith.constant 0 : i32
    %c0_i32_1 = arith.constant 0 : i32
    return %c0_i32, %c0_i32_0 : i32, i32
  }
}

</mosaic_0001>

<bundles_post_ra>
// kernel: tpu_custom_call.1
= control target key start
LH: loop header
LB: loop body
LE: loop exit
PB: predicated region body
PF: predicated region fallthrough
CT: control target
= control target key end

     0   :  { %8 = vsyncpa [#allocation4], 0  ;;  %s1499_s12 = smov 0   ;;  %s1964_s0 = inlined_call_operand.vmem [shape: f32[256,128], index: 0, kind: input, shape index: {}]   ;;  %s1965_s1 = inlined_call_operand.vmem [shape: f32[256,32], index: 1, kind: input, shape index: {}]   ;;  %s1966_s2 = inlined_call_operand.vmem [shape: f32[128,4], index: 2, kind: input, shape index: {}]   ;;  %s1967_s3 = inlined_call_operand.hbm [shape: f32[128,128], index: 3, kind: output, shape index: {}]  }
   0x1 LB: > { %s1505_s13 = sadd.s32 4294967295, %s1466_s12   ;;  %p1250_p0 = scmp.ge.s32.totalorder %s1466_s12, 1  ;;  %s1466_s12 = sphi %s1499_s12, %s14_s12  }
   0x2   : > { %p145_p1 = scmp.lt.s32.totalorder %s1466_s12, 3 }
   0x4   : > { %p146_p2 = pnand %p1250_p0, %p145_p1 }
   0x5   : > { %s1251_s14 = sshll.u32 (!%p146_p2), %s1505_s13, 4  ;;  %p1255_p4 = scmp.ne.s32.totalorder (!%p146_p2), %s1505_s13, 0 }
   0x6   : > { %149 = sbr.rel (%p146_p2) target bundleno = 842 (0x34a), region = 32  ;;  %p170_p3 = scmp.lt.s32.totalorder (!%p146_p2), %s1251_s14, 31 }
   0xd   : > { %s1969_s14 = smov (!%p170_p3, %s1251_s14), 31  ;;  %184 = sbr.rel (%p1255_p4) target bundleno = 23 (0x17), region = 36 }
   0xe   : > { %s1252_s15 = sshll.u32 %s1969_s14, 3  ;;  %vm185_vm0 = vcmask (!%p1255_p4), 261120   ;;  %v1468_v0 = vmov (!%p1255_p4), 0.0  }
   0xf   : > { %s1513_s18 = scalar_lea.vmem %s1964_s0, %s1252_s15  ;;  %s1518_s21 = scalar_lea.vmem %s1965_s1, %s1252_s15  ;;  %186 = vst.msk [vmem:[#allocation2] sm:$0xff] (!%p1255_p4), %vm185_vm0, %v1468_v0  ;;  %187 = vst.msk [vmem:[#allocation2 + $0x8] sm:$0xff] (!%p1255_p4), %vm185_vm0, %v1468_v0 }
  0x10   : > { %188 = vst.msk [vmem:[#allocation2 + $0x10] sm:$0xff] (!%p1255_p4), %vm185_vm0, %v1468_v0  ;;  %189 = vst.msk [vmem:[#allocation2 + $0x18] sm:$0xff] (!%p1255_p4), %vm185_vm0, %v1468_v0 }
  0x11   : > { %190 = vst.msk [vmem:[#allocation2 + $0x20] sm:$0xff] (!%p1255_p4), %vm185_vm0, %v1468_v0  ;;  %191 = vst.msk [vmem:[#allocation2 + $0x28] sm:$0xff] (!%p1255_p4), %vm185_vm0, %v1468_v0 }
  0x12   : > { %192 = vst.msk [vmem:[#allocation2 + $0x30] sm:$0xff] (!%p1255_p4), %vm185_vm0, %v1468_v0  ;;  %193 = vst.msk [vmem:[#allocation2 + $0x38] sm:$0xff] (!%p1255_p4), %vm185_vm0, %v1468_v0 }
  0x13   : > { %194 = vst.msk [vmem:[#allocation2 + $0x40] sm:$0xff] (!%p1255_p4), %vm185_vm0, %v1468_v0  ;;  %195 = vst.msk [vmem:[#allocation2 + $0x48] sm:$0xff] (!%p1255_p4), %vm185_vm0, %v1468_v0 }
  0x14   : > { %196 = vst.msk [vmem:[#allocation2 + $0x50] sm:$0xff] %vm185_vm0, %v1468_v0  ;;  %197 = vst.msk [vmem:[#allocation2 + $0x58] sm:$0xff] %vm185_vm0, %v1468_v0 }
  0x15   : > { %198 = vst.msk [vmem:[#allocation2 + $0x60] sm:$0xff] %vm185_vm0, %v1468_v0  ;;  %199 = vst.msk [vmem:[#allocation2 + $0x68] sm:$0xff] %vm185_vm0, %v1468_v0 }
  0x16   : > { %200 = vst.msk [vmem:[#allocation2 + $0x70] sm:$0xff] %vm185_vm0, %v1468_v0  ;;  %201 = vst.msk [vmem:[#allocation2 + $0x78] sm:$0xff] %vm185_vm0, %v1468_v0 }
  0x17 PF: > { %v218_v1 = vld [vmem:[%s1513_s18] sm:$0xff]  ;;  %v219_v2 = vld [vmem:[%s1513_s18 + $0x8] sm:$0xff]  ;;  %v220_v5 = vld [vmem:[%s1513_s18 + $0x10] sm:$0xff]  ;;  %vm443_vm1 = vcmask 261120   ;;  %p1256_p5 = scmp.ne.s32.totalorder %s1505_s13, 1 }
  0x18   : > { %250 = vxpose.xlu0.b32.start [1/16] %v218_v1, 128  ;;  %v234_v3 = vld [vmem:[%s1518_s21] sm:$0xff]  ;;  %v235_v4 = vld [vmem:[%s1518_s21 + $0x8] sm:$0xff]  ;;  %v236_v7 = vld [vmem:[%s1518_s21 + $0x10] sm:$0xff]  ;;  %s1473_s29 = smov (!%p1256_p5), 32   ;;  %s1474_s30 = smov (!%p1256_p5), 64   ;;  %vm784_vm2 = vcmask (!%p1256_p5), 523520  }
  0x19   : > { %v1349_v6 = vpack.c.bf16 %v235_v4, %v234_v3  ;;  %v237_v8 = vld [vmem:[%s1518_s21 + $0x18] sm:$0xff]  ;;  %v238_v10 = vld [vmem:[%s1518_s21 + $0x20] sm:$0xff]  ;;  %v239_v11 = vld [vmem:[%s1518_s21 + $0x28] sm:$0xff]  ;;  %vm977_vm3 = vcmask (!%p1256_p5), 785920   ;;  %s1475_s4 = smov (!%p1256_p5), 96   ;;  %vm1170_vm4 = vcmask (!%p1256_p5), 1048320  }
  0x1a   : > { %v1353_v9 = vpack.c.bf16 %v237_v8, %v236_v7  ;;  %v221_v12 = vld [vmem:[%s1513_s18 + $0x18] sm:$0xff]  ;;  %v1357_v13 = vpack.c.bf16 %v239_v11, %v238_v10  ;;  %v240_v14 = vld [vmem:[%s1518_s21 + $0x30] sm:$0xff]  ;;  %v222_v16 = vld [vmem:[%s1513_s18 + $0x20] sm:$0xff] }
  0x1b   : > { %1350 = vmatprep.subr.bf16.mxu0 %v1349_v6  ;;  %1381 = vmatprep.subr.bf16.mxu1 %v1349_v6  ;;  %v241_v15 = vld [vmem:[%s1518_s21 + $0x38] sm:$0xff]  ;;  %v242_v18 = vld [vmem:[%s1518_s21 + $0x40] sm:$0xff]  ;;  %v243_v19 = vld [vmem:[%s1518_s21 + $0x48] sm:$0xff] }
  0x1c   : > { %251 = vxpose.xlu0.b32.cont [2/16] %v219_v2, 128  ;;  %1352 = vmatpush3.bf16.msra.mxu0 %v1349_v6  ;;  %v1361_v17 = vpack.c.bf16 %v241_v15, %v240_v14  ;;  %v223_v20 = vld [vmem:[%s1513_s18 + $0x28] sm:$0xff]  ;;  %v1365_v21 = vpack.c.bf16 %v243_v19, %v242_v18  ;;  %v244_v22 = vld [vmem:[%s1518_s21 + $0x50] sm:$0xff]  ;;  %v245_v23 = vld [vmem:[%s1518_s21 + $0x58] sm:$0xff] }
  0x1d   : > { %1354 = vmatprep.subr.bf16.mxu0 %v1353_v9  ;;  %1389 = vmatpush3.bf16.msra.mxu1 %v1349_v6  ;;  %v224_v24 = vld [vmem:[%s1513_s18 + $0x30] sm:$0xff]  ;;  %v1369_v25 = vpack.c.bf16 %v245_v23, %v244_v22  ;;  %v246_v26 = vld [vmem:[%s1518_s21 + $0x60] sm:$0xff]  ;;  %v247_v27 = vld [vmem:[%s1518_s21 + $0x68] sm:$0xff] }
  0x1e   : > { %1382 = vmatprep.subr.bf16.mxu1 %v1353_v9  ;;  %v225_v28 = vld [vmem:[%s1513_s18 + $0x38] sm:$0xff]  ;;  %v1373_v29 = vpack.c.bf16 %v247_v27, %v246_v26  ;;  %v248_v30 = vld [vmem:[%s1518_s21 + $0x70] sm:$0xff]  ;;  %v226_v32 = vld [vmem:[%s1513_s18 + $0x40] sm:$0xff] }
  0x1f   : > { %v249_v31 = vld [vmem:[%s1518_s21 + $0x78] sm:$0xff]  ;;  %v227_v34 = vld [vmem:[%s1513_s18 + $0x48] sm:$0xff]  ;;  %v228_v35 = vld [vmem:[%s1513_s18 + $0x50] sm:$0xff] }
  0x20   : > { %252 = vxpose.xlu0.b32.cont [3/16] %v220_v5, 128  ;;  %1356 = vmatpush3.bf16.msra.mxu0 %v1353_v9  ;;  %v1377_v33 = vpack.c.bf16 %v249_v31, %v248_v30  ;;  %v229_v36 = vld [vmem:[%s1513_s18 + $0x58] sm:$0xff]  ;;  %v230_v37 = vld [vmem:[%s1513_s18 + $0x60] sm:$0xff]  ;;  %v231_v38 = vld [vmem:[%s1513_s18 + $0x68] sm:$0xff] }
  0x21   : > { %1358 = vmatprep.subr.bf16.mxu0 %v1357_v13  ;;  %1390 = vmatpush3.bf16.msra.mxu1 %v1353_v9  ;;  %v232_v39 = vld [vmem:[%s1513_s18 + $0x70] sm:$0xff]  ;;  %v233_v40 = vld [vmem:[%s1513_s18 + $0x78] sm:$0xff]  ;;  %v203_v57 = vld [vmem:[#allocation2 + $0x8] sm:$0xff] }
  0x22   : > { %1383 = vmatprep.subr.bf16.mxu1 %v1357_v13  ;;  %v202_v58 = vld [vmem:[#allocation2] sm:$0xff]  ;;  %v205_v63 = vld [vmem:[#allocation2 + $0x18] sm:$0xff]  ;;  %v204_v0 = vld [vmem:[#allocation2 + $0x10] sm:$0xff] }
  0x23   : > { %v207_v5 = vld [vmem:[#allocation2 + $0x28] sm:$0xff]  ;;  %v206_v6 = vld [vmem:[#allocation2 + $0x20] sm:$0xff]  ;;  %v209_v11 = vld [vmem:[#allocation2 + $0x38] sm:$0xff] }
  0x24   : > { %253 = vxpose.xlu0.b32.cont [4/16] %v221_v12, 128  ;;  %1360 = vmatpush3.bf16.msra.mxu0 %v1357_v13  ;;  %v208_v12 = vld [vmem:[#allocation2 + $0x30] sm:$0xff]  ;;  %v210_v18 = vld [vmem:[#allocation2 + $0x40] sm:$0xff]  ;;  %v213_v23 = vld [vmem:[#allocation2 + $0x58] sm:$0xff] }
  0x25   : > { %1362 = vmatprep.subr.bf16.mxu0 %v1361_v17  ;;  %1391 = vmatpush3.bf16.msra.mxu1 %v1357_v13  ;;  %v214_v30 = vld [vmem:[#allocation2 + $0x60] sm:$0xff] }
  0x26   : > { %1384 = vmatprep.subr.bf16.mxu1 %v1361_v17 }
  0x28   : > { %254 = vxpose.xlu0.b32.cont [5/16] %v222_v16, 128  ;;  %1364 = vmatpush3.bf16.msra.mxu0 %v1361_v17 }
  0x29   : > { %1366 = vmatprep.subr.bf16.mxu0 %v1365_v21  ;;  %1392 = vmatpush3.bf16.msra.mxu1 %v1361_v17  ;;  %v211_v17 = vld [vmem:[#allocation2 + $0x48] sm:$0xff] }
  0x2a   : > { %1385 = vmatprep.subr.bf16.mxu1 %v1365_v21 }
  0x2c   : > { %255 = vxpose.xlu0.b32.cont [6/16] %v223_v20, 128  ;;  %1368 = vmatpush3.bf16.msra.mxu0 %v1365_v21 }
  0x2d   : > { %1370 = vmatprep.subr.bf16.mxu0 %v1369_v25  ;;  %1393 = vmatpush3.bf16.msra.mxu1 %v1365_v21 }
  0x2e   : > { %1386 = vmatprep.subr.bf16.mxu1 %v1369_v25 }
  0x30   : > { %256 = vxpose.xlu0.b32.cont [7/16] %v224_v24, 128  ;;  %1372 = vmatpush3.bf16.msra.mxu0 %v1369_v25  ;;  %v212_v24 = vld [vmem:[#allocation2 + $0x50] sm:$0xff] }
  0x31   : > { %1374 = vmatprep.subr.bf16.mxu0 %v1373_v29  ;;  %1394 = vmatpush3.bf16.msra.mxu1 %v1369_v25 }
  0x32   : > { %1387 = vmatprep.subr.bf16.mxu1 %v1373_v29 }
  0x34   : > { %257 = vxpose.xlu0.b32.cont [8/16] %v225_v28, 128  ;;  %1376 = vmatpush3.bf16.msra.mxu0 %v1373_v29 }
  0x35   : > { %1378 = vmatprep.subr.bf16.mxu0 %v1377_v33  ;;  %1395 = vmatpush3.bf16.msra.mxu1 %v1373_v29  ;;  %v215_v29 = vld [vmem:[#allocation2 + $0x68] sm:$0xff] }
  0x36   : > { %1388 = vmatprep.subr.bf16.mxu1 %v1377_v33 }
  0x38   : > { %258 = vxpose.xlu0.b32.cont [9/16] %v226_v32, 128  ;;  %1380 = vmatpush3.bf16.msra.mxu0 %v1377_v33 }
  0x39   : > { %1396 = vmatpush3.bf16.msra.mxu1 %v1377_v33 }
  0x3c   : > { %259 = vxpose.xlu0.b32.cont [10/16] %v227_v34, 128 }
  0x40   : > { %260 = vxpose.xlu0.b32.cont [11/16] %v228_v35, 128  ;;  %v217_v35 = vld [vmem:[#allocation2 + $0x78] sm:$0xff] }
  0x44   : > { %261 = vxpose.xlu0.b32.cont [12/16] %v229_v36, 128  ;;  %v216_v36 = vld [vmem:[#allocation2 + $0x70] sm:$0xff] }
  0x48   : > { %262 = vxpose.xlu0.b32.cont [13/16] %v230_v37, 128 }
  0x4c   : > { %263 = vxpose.xlu0.b32.cont [14/16] %v231_v38, 128 }
  0x50   : > { %264 = vxpose.xlu0.b32.cont [15/16] %v232_v39, 128 }
  0x54   : > { %265 = vxpose.xlu0.b32.end [16/16] %v233_v40, 128 }
  0x98   : > { %v266_v41 = vpop.trf.xlu0 }
  0x99   : > { %1325 = vmatprep.mubr.f32.mxu0 %v266_v41  ;;  %v1589_v41 = vld [vmem:[%s1966_s2 + $0x10] sm:$0xff] (!%p1256_p5) }
  0x9c   : > { %v267_v42 = vpop.trf.xlu0 }
  0x9d   : > { %1326 = vmatmul.mubr.f32.vlgmr.msra.gmra.mrb[0].mxu0 %v267_v42  ;;  %v1594_v42 = vld [vmem:[%s1966_s2] sm:$0xff] (!%p1256_p5) }
  0xa0   : > { %v268_v43 = vpop.trf.xlu0 }
  0xa1   : > { %1328 = vmatprep.mubr.f32.mxu0 %v268_v43  ;;  %v1469_v43 = vmov (!%p1256_p5), 0  }
  0xa2   : > { %1423 = vset.pattern.permute.xlu1 (!%p1256_p5), %v1469_v43  ;;  %1422 = vset.pattern.permute.xlu0 (!%p1256_p5), %v1469_v43 }
  0xa3   : > { %508 = vperm.xlu1 (!%p1256_p5), %1423, %v1589_v41   ;;  %498 = vperm.xlu0 (!%p1256_p5), %1422, %v1594_v42  }
  0xa4   : > { %v269_v44 = vpop.trf.xlu0 }
  0xa5   : > { %1329 = vmatmul.mubr.f32.gmra.mrb[2].mxu0 %v269_v44  ;;  %v1601_v44 = vld [vmem:[%s1966_s2 + $0x18] sm:$0xff] (!%p1256_p5) }
  0xa7   : > { %513 = vperm.xlu1 (!%p1256_p5), %1423, %v1601_v44  }
  0xa8   : > { %v270_v45 = vpop.trf.xlu0 }
  0xa9   : > { %1331 = vmatprep.mubr.f32.mxu0 %v270_v45  ;;  %v1606_v45 = vld [vmem:[%s1966_s2 + $0x8] sm:$0xff] (!%p1256_p5) }
  0xaa   : > { %503 = vperm.xlu0 (!%p1256_p5), %1422, %v1606_v45  }
  0xac   : > { %v271_v46 = vpop.trf.xlu0 }
  0xad   : > { %1332 = vmatmul.mubr.f32.gmra.mrb[4].mxu0 %v271_v46  ;;  %v1613_v46 = vld [vmem:[%s1966_s2 + $0x28] sm:$0xff] (!%p1256_p5) }
  0xae   : > { %523 = vperm.xlu1 (!%p1256_p5), %1423, %v1613_v46  }
  0xb0   : > { %v272_v47 = vpop.trf.xlu0 }
  0xb1   : > { %1334 = vmatprep.mubr.f32.mxu0 %v272_v47  ;;  %v1618_v47 = vld [vmem:[%s1966_s2 + $0x20] sm:$0xff] (!%p1256_p5) }
  0xb2   : > { %518 = vperm.xlu0 (!%p1256_p5), %1422, %v1618_v47  }
  0xb4   : > { %v273_v48 = vpop.trf.xlu0 }
  0xb5   : > { %1335 = vmatmul.mubr.f32.gmra.mrb[6].mxu0 %v273_v48  ;;  %v1625_v48 = vld [vmem:[%s1966_s2 + $0x38] sm:$0xff] (!%p1256_p5) }
  0xb6   : > { %533 = vperm.xlu1 (!%p1256_p5), %1423, %v1625_v48  }
  0xb8   : > { %v274_v49 = vpop.trf.xlu0 }
  0xb9   : > { %1337 = vmatprep.mubr.f32.mxu1 %v274_v49  ;;  %v1630_v49 = vld [vmem:[%s1966_s2 + $0x30] sm:$0xff] (!%p1256_p5) }
  0xba   : > { %528 = vperm.xlu0 (!%p1256_p5), %1422, %v1630_v49  }
  0xbc   : > { %v275_v50 = vpop.trf.xlu0 }
  0xbd   : > { %1338 = vmatmul.mubr.f32.vlgmr.msra.gmra.mrb[0].mxu1 %v275_v50  ;;  %v1637_v50 = vld [vmem:[%s1966_s2 + $0x48] sm:$0xff] (!%p1256_p5) }
  0xbe   : > { %543 = vperm.xlu1 (!%p1256_p5), %1423, %v1637_v50  }
  0xc0   : > { %v276_v51 = vpop.trf.xlu0 }
  0xc1   : > { %1340 = vmatprep.mubr.f32.mxu1 %v276_v51  ;;  %v1642_v51 = vld [vmem:[%s1966_s2 + $0x40] sm:$0xff] (!%p1256_p5) }
  0xc2   : > { %538 = vperm.xlu0 (!%p1256_p5), %1422, %v1642_v51  }
  0xc4   : > { %v277_v52 = vpop.trf.xlu0 }
  0xc5   : > { %1341 = vmatmul.mubr.f32.gmra.mrb[2].mxu1 %v277_v52  ;;  %v1649_v52 = vld [vmem:[%s1966_s2 + $0x58] sm:$0xff] (!%p1256_p5) }
  0xc6   : > { %553 = vperm.xlu1 (!%p1256_p5), %1423, %v1649_v52  }
  0xc8   : > { %v278_v53 = vpop.trf.xlu0 }
  0xc9   : > { %1343 = vmatprep.mubr.f32.mxu1 %v278_v53  ;;  %v1654_v53 = vld [vmem:[%s1966_s2 + $0x50] sm:$0xff] (!%p1256_p5) }
  0xca   : > { %548 = vperm.xlu0 (!%p1256_p5), %1422, %v1654_v53  }
  0xcc   : > { %v279_v54 = vpop.trf.xlu0 }
  0xcd   : > { %1344 = vmatmul.mubr.f32.gmra.mrb[4].mxu1 %v279_v54  ;;  %v1661_v54 = vld [vmem:[%s1966_s2 + $0x68] sm:$0xff] (!%p1256_p5) }
  0xce   : > { %563 = vperm.xlu1 (!%p1256_p5), %1423, %v1661_v54  }
  0xd0   : > { %v280_v55 = vpop.trf.xlu0 }
  0xd1   : > { %1346 = vmatprep.mubr.f32.mxu1 %v280_v55  ;;  %v1666_v55 = vld [vmem:[%s1966_s2 + $0x60] sm:$0xff] (!%p1256_p5) }
  0xd2   : > { %558 = vperm.xlu0 (!%p1256_p5), %1422, %v1666_v55  }
  0xd4   : > { %v281_v56 = vpop.trf.xlu0 }
  0xd5   : > { %1347 = vmatmul.mubr.f32.gmra.mrb[6].mxu1 %v281_v56  ;;  %v1673_v56 = vld [vmem:[%s1966_s2 + $0x78] sm:$0xff] (!%p1256_p5) }
  0xd6   : > { %573 = vperm.xlu1 (!%p1256_p5), %1423, %v1673_v56  }
 0x170   : > { %v1327_v59 = vpop.f32.mrb[0].mxu0 }
 0x171   : > { %v428_v60 = vadd.f32 %v1327_v59, %v203_v57  ;;  %v348_v61 = vpop.f32.mrb[1].mxu0  ;;  %v1678_v57 = vld [vmem:[%s1966_s2 + $0x70] sm:$0xff] (!%p1256_p5)  ;;  %v1471_v59 = vmov (!%p1256_p5), 2  }
 0x172   : > { %v427_v62 = vadd.f32 %v348_v61, %v202_v58  ;;  %568 = vperm.xlu0 (!%p1256_p5), %1422, %v1678_v57   ;;  %v1470_v58 = vmov (!%p1256_p5), 1  }
 0x173   : > { %445 = vst.msk [vmem:[#allocation2 + $0x8] sm:$0xff] %vm443_vm1, %v428_v60  ;;  %1425 = vset.pattern.permute.xlu1 (!%p1256_p5), %v1470_v58  ;;  %v1472_v60 = vmov (!%p1256_p5), 3  }
 0x174   : > { %444 = vst.msk [vmem:[#allocation2] sm:$0xff] %vm443_vm1, %v427_v62  ;;  %631 = vperm.xlu1 (!%p1256_p5), %1425, %v1606_v45  }
 0x176   : > { %1424 = vset.pattern.permute.xlu0 (!%p1256_p5), %v1470_v58 }
 0x177   : > { %626 = vperm.xlu0 (!%p1256_p5), %1424, %v1594_v42  }
 0x178   : > { %v1330_v1 = vpop.f32.mrb[2].mxu0  ;;  %636 = vperm.xlu1 (!%p1256_p5), %1425, %v1589_v41  }
 0x179   : > { %v430_v2 = vadd.f32 %v1330_v1, %v205_v63  ;;  %v358_v3 = vpop.f32.mrb[3].mxu0  ;;  %v509_v63 = vpop.permute.xlu1 (!%p1256_p5), %508 }
 0x17a   : > { %v429_v4 = vadd.f32 %v358_v3, %v204_v0  ;;  %v499_v0 = vpop.permute.xlu0 (!%p1256_p5), %498 }
 0x17b   : > { %447 = vst.msk [vmem:[#allocation2 + $0x18] sm:$0xff] %vm443_vm1, %v430_v2  ;;  %641 = vperm.xlu0 (!%p1256_p5), %1424, %v1601_v44   ;;  %v1716_v62 = vld [vmem:[#allocation2] sm:$0xff] (!%p1256_p5) }
 0x17c   : > { %446 = vst.msk [vmem:[#allocation2 + $0x10] sm:$0xff] %vm443_vm1, %v429_v4  ;;  %646 = vperm.xlu1 (!%p1256_p5), %1425, %v1618_v47   ;;  %v576_v2 = vmul.f32 (!%p1256_p5), %v499_v0, %v1716_v62  ;;  %v1722_v4 = vld [vmem:[#allocation2 + $0x8] sm:$0xff] (!%p1256_p5) }
 0x17e   : > { %592 = vst.msk [vmem:[#allocation3] sm:$0xff] (!%p1256_p5), %vm443_vm1, %v576_v2 }
 0x17f   : > { %651 = vperm.xlu0 (!%p1256_p5), %1424, %v1613_v46  }
 0x180   : > { %v1333_v7 = vpop.f32.mrb[4].mxu0  ;;  %656 = vperm.xlu1 (!%p1256_p5), %1425, %v1630_v49  }
 0x181   : > { %v432_v8 = vadd.f32 %v1333_v7, %v207_v5  ;;  %v368_v9 = vpop.f32.mrb[5].mxu0  ;;  %v514_v5 = vpop.permute.xlu1 (!%p1256_p5), %513 }
 0x182   : > { %v431_v10 = vadd.f32 %v368_v9, %v206_v6  ;;  %v1720_v3 = vld [vmem:[#allocation2 + $0x18] sm:$0xff] (!%p1256_p5)  ;;  %v504_v6 = vpop.permute.xlu0 (!%p1256_p5), %503 }
 0x183   : > { %449 = vst.msk [vmem:[#allocation2 + $0x28] sm:$0xff] %vm443_vm1, %v432_v8  ;;  %661 = vperm.xlu0 (!%p1256_p5), %1424, %v1625_v48   ;;  %v1714_v61 = vld [vmem:[#allocation2 + $0x10] sm:$0xff] (!%p1256_p5)  ;;  %v579_v7 = vmul.f32 (!%p1256_p5), %v514_v5, %v1720_v3  ;;  %v577_v8 = vmul.f32 (!%p1256_p5), %v504_v6, %v1722_v4 }
 0x184   : > { %448 = vst.msk [vmem:[#allocation2 + $0x20] sm:$0xff] %vm443_vm1, %v431_v10  ;;  %666 = vperm.xlu1 (!%p1256_p5), %1425, %v1642_v51   ;;  %v578_v1 = vmul.f32 (!%p1256_p5), %v509_v63, %v1714_v61 }
 0x185   : > { %595 = vst.msk [vmem:[#allocation3 + $0x18] sm:$0xff] (!%p1256_p5), %vm443_vm1, %v579_v7  ;;  %593 = vst.msk [vmem:[#allocation3 + $0x8] sm:$0xff] (!%p1256_p5), %vm443_vm1, %v577_v8 }
 0x186   : > { %594 = vst.msk [vmem:[#allocation3 + $0x10] sm:$0xff] (!%p1256_p5), %vm443_vm1, %v578_v1 }
 0x187   : > { %671 = vperm.xlu0 (!%p1256_p5), %1424, %v1637_v50  }
 0x188   : > { %v1336_v13 = vpop.f32.mrb[6].mxu0  ;;  %676 = vperm.xlu1 (!%p1256_p5), %1425, %v1654_v53  }
 0x189   : > { %v434_v14 = vadd.f32 %v1336_v13, %v209_v11  ;;  %v378_v15 = vpop.f32.mrb[7].mxu0  ;;  %v524_v11 = vpop.permute.xlu1 (!%p1256_p5), %523 }
 0x18a   : > { %v433_v16 = vadd.f32 %v378_v15, %v208_v12  ;;  %v1728_v9 = vld [vmem:[#allocation2 + $0x28] sm:$0xff] (!%p1256_p5)  ;;  %v519_v12 = vpop.permute.xlu0 (!%p1256_p5), %518 }
 0x18b   : > { %451 = vst.msk [vmem:[#allocation2 + $0x38] sm:$0xff] %vm443_vm1, %v434_v14  ;;  %681 = vperm.xlu0 (!%p1256_p5), %1424, %v1649_v52   ;;  %v1730_v10 = vld [vmem:[#allocation2 + $0x20] sm:$0xff] (!%p1256_p5)  ;;  %v581_v13 = vmul.f32 (!%p1256_p5), %v524_v11, %v1728_v9 }
 0x18c   : > { %450 = vst.msk [vmem:[#allocation2 + $0x30] sm:$0xff] %vm443_vm1, %v433_v16  ;;  %686 = vperm.xlu1 (!%p1256_p5), %1425, %v1666_v55   ;;  %v580_v14 = vmul.f32 (!%p1256_p5), %v519_v12, %v1730_v10 }
 0x18d   : > { %597 = vst.msk [vmem:[#allocation3 + $0x28] sm:$0xff] (!%p1256_p5), %vm443_vm1, %v581_v13 }
 0x18e   : > { %596 = vst.msk [vmem:[#allocation3 + $0x20] sm:$0xff] (!%p1256_p5), %vm443_vm1, %v580_v14 }
 0x18f   : > { %691 = vperm.xlu0 (!%p1256_p5), %1424, %v1661_v54  }
 0x190   : > { %v1339_v19 = vpop.f32.mrb[0].mxu1  ;;  %696 = vperm.xlu1 (!%p1256_p5), %1425, %v1678_v57  }
 0x191   : > { %v436_v20 = vadd.f32 %v1339_v19, %v211_v17  ;;  %v388_v21 = vpop.f32.mrb[1].mxu1  ;;  %v534_v17 = vpop.permute.xlu1 (!%p1256_p5), %533 }
 0x192   : > { %v435_v22 = vadd.f32 %v388_v21, %v210_v18  ;;  %v1736_v15 = vld [vmem:[#allocation2 + $0x38] sm:$0xff] (!%p1256_p5)  ;;  %v529_v18 = vpop.permute.xlu0 (!%p1256_p5), %528 }
 0x193   : > { %453 = vst.msk [vmem:[#allocation2 + $0x48] sm:$0xff] %vm443_vm1, %v436_v20  ;;  %701 = vperm.xlu0 (!%p1256_p5), %1424, %v1673_v56   ;;  %v1738_v16 = vld [vmem:[#allocation2 + $0x30] sm:$0xff] (!%p1256_p5)  ;;  %v583_v19 = vmul.f32 (!%p1256_p5), %v534_v17, %v1736_v15 }
 0x194   : > { %452 = vst.msk [vmem:[#allocation2 + $0x40] sm:$0xff] %vm443_vm1, %v435_v22  ;;  %1426 = vset.pattern.permute.xlu1 (!%p1256_p5), %v1471_v59  ;;  %v582_v20 = vmul.f32 (!%p1256_p5), %v529_v18, %v1738_v16 }
 0x195   : > { %819 = vperm.xlu1 (!%p1256_p5), %1426, %v1594_v42   ;;  %599 = vst.msk [vmem:[#allocation3 + $0x38] sm:$0xff] (!%p1256_p5), %vm443_vm1, %v583_v19 }
 0x196   : > { %598 = vst.msk [vmem:[#allocation3 + $0x30] sm:$0xff] (!%p1256_p5), %vm443_vm1, %v582_v20 }
 0x197   : > { %1427 = vset.pattern.permute.xlu0 (!%p1256_p5), %v1471_v59 }
 0x198   : > { %v1342_v25 = vpop.f32.mrb[2].mxu1  ;;  %824 = vperm.xlu0 (!%p1256_p5), %1427, %v1606_v45  }
 0x199   : > { %v438_v26 = vadd.f32 %v1342_v25, %v213_v23  ;;  %v398_v27 = vpop.f32.mrb[3].mxu1  ;;  %829 = vperm.xlu1 (!%p1256_p5), %1426, %v1589_v41   ;;  %v544_v23 = vpop.permute.xlu1 (!%p1256_p5), %543 }
 0x19a   : > { %v437_v28 = vadd.f32 %v398_v27, %v212_v24  ;;  %v1744_v21 = vld [vmem:[#allocation2 + $0x48] sm:$0xff] (!%p1256_p5)  ;;  %v539_v24 = vpop.permute.xlu0 (!%p1256_p5), %538 }
 0x19b   : > { %455 = vst.msk [vmem:[#allocation2 + $0x58] sm:$0xff] %vm443_vm1, %v438_v26  ;;  %v1746_v22 = vld [vmem:[#allocation2 + $0x40] sm:$0xff] (!%p1256_p5)  ;;  %v585_v25 = vmul.f32 (!%p1256_p5), %v544_v23, %v1744_v21 }
 0x19c   : > { %454 = vst.msk [vmem:[#allocation2 + $0x50] sm:$0xff] %vm443_vm1, %v437_v28  ;;  %839 = vperm.xlu0 (!%p1256_p5), %1427, %v1618_v47   ;;  %v584_v26 = vmul.f32 (!%p1256_p5), %v539_v24, %v1746_v22 }
 0x19d   : > { %834 = vperm.xlu1 (!%p1256_p5), %1426, %v1601_v44   ;;  %601 = vst.msk [vmem:[#allocation3 + $0x48] sm:$0xff] (!%p1256_p5), %vm443_vm1, %v585_v25 }
 0x19e   : > { %600 = vst.msk [vmem:[#allocation3 + $0x40] sm:$0xff] (!%p1256_p5), %vm443_vm1, %v584_v26 }
 0x1a0   : > { %v1345_v31 = vpop.f32.mrb[4].mxu1  ;;  %849 = vperm.xlu0 (!%p1256_p5), %1427, %v1630_v49  }
 0x1a1   : > { %v440_v32 = vadd.f32 %v1345_v31, %v215_v29  ;;  %v408_v33 = vpop.f32.mrb[5].mxu1  ;;  %844 = vperm.xlu1 (!%p1256_p5), %1426, %v1613_v46   ;;  %v554_v29 = vpop.permute.xlu1 (!%p1256_p5), %553 }
 0x1a2   : > { %v439_v34 = vadd.f32 %v408_v33, %v214_v30  ;;  %v1752_v27 = vld [vmem:[#allocation2 + $0x58] sm:$0xff] (!%p1256_p5)  ;;  %v549_v30 = vpop.permute.xlu0 (!%p1256_p5), %548 }
 0x1a3   : > { %457 = vst.msk [vmem:[#allocation2 + $0x68] sm:$0xff] %vm443_vm1, %v440_v32  ;;  %v1754_v28 = vld [vmem:[#allocation2 + $0x50] sm:$0xff] (!%p1256_p5)  ;;  %v587_v31 = vmul.f32 (!%p1256_p5), %v554_v29, %v1752_v27 }
 0x1a4   : > { %456 = vst.msk [vmem:[#allocation2 + $0x60] sm:$0xff] %vm443_vm1, %v439_v34  ;;  %859 = vperm.xlu0 (!%p1256_p5), %1427, %v1642_v51   ;;  %v586_v32 = vmul.f32 (!%p1256_p5), %v549_v30, %v1754_v28 }
 0x1a5   : > { %854 = vperm.xlu1 (!%p1256_p5), %1426, %v1625_v48   ;;  %603 = vst.msk [vmem:[#allocation3 + $0x58] sm:$0xff] (!%p1256_p5), %vm443_vm1, %v587_v31 }
 0x1a6   : > { %463 = sbr.rel (%p1256_p5) target bundleno = 816 (0x330), region = 40  ;;  %602 = vst.msk [vmem:[#allocation3 + $0x50] sm:$0xff] (!%p1256_p5), %vm443_vm1, %v586_v32 }
 0x1a8   : > { %v1348_v37 = vpop.f32.mrb[6].mxu1  ;;  %869 = vperm.xlu0 (!%p1256_p5), %1427, %v1654_v53  }
 0x1a9   : > { %v442_v38 = vadd.f32 %v1348_v37, %v217_v35  ;;  %v418_v39 = vpop.f32.mrb[7].mxu1  ;;  %864 = vperm.xlu1 (!%p1256_p5), %1426, %v1637_v50   ;;  %v564_v35 = vpop.permute.xlu1 (!%p1256_p5), %563 }
 0x1aa   : > { %v441_v40 = vadd.f32 %v418_v39, %v216_v36  ;;  %v1760_v33 = vld [vmem:[#allocation2 + $0x68] sm:$0xff] (!%p1256_p5)  ;;  %v559_v36 = vpop.permute.xlu0 (!%p1256_p5), %558 }
 0x1ab   : > { %459 = vst.msk [vmem:[#allocation2 + $0x78] sm:$0xff] %vm443_vm1, %v442_v38  ;;  %v1762_v34 = vld [vmem:[#allocation2 + $0x60] sm:$0xff] (!%p1256_p5)  ;;  %v589_v37 = vmul.f32 (!%p1256_p5), %v564_v35, %v1760_v33 }
 0x1ac   : > { %458 = vst.msk [vmem:[#allocation2 + $0x70] sm:$0xff] %vm443_vm1, %v441_v40  ;;  %879 = vperm.xlu0 (!%p1256_p5), %1427, %v1666_v55   ;;  %v588_v38 = vmul.f32 (!%p1256_p5), %v559_v36, %v1762_v34 }
 0x1ad   : > { %874 = vperm.xlu1 %1426, %v1649_v52   ;;  %605 = vst.msk [vmem:[#allocation3 + $0x68] sm:$0xff] %vm443_vm1, %v589_v37  ;;  %v574_v43 = vpop.permute.xlu1 %573 }
 0x1ae   : > { %604 = vst.msk [vmem:[#allocation3 + $0x60] sm:$0xff] %vm443_vm1, %v588_v38 }
 0x1b0   : > { %889 = vperm.xlu0 %1427, %v1678_v57  }
 0x1b1   : > { %884 = vperm.xlu1 %1426, %v1661_v54  }
 0x1b2   : > { %v1768_v39 = vld [vmem:[#allocation2 + $0x78] sm:$0xff] }
 0x1b3   : > { %v1770_v40 = vld [vmem:[#allocation2 + $0x70] sm:$0xff]  ;;  %v591_v59 = vmul.f32 %v574_v43, %v1768_v39 }
 0x1b4   : > { %1428 = vset.pattern.permute.xlu0 %v1472_v60 }
 0x1b5   : > { %894 = vperm.xlu1 %1426, %v1673_v56   ;;  %607 = vst.msk [vmem:[#allocation3 + $0x78] sm:$0xff] %vm443_vm1, %v591_v59 }
 0x1b9   : > { %1429 = vset.pattern.permute.xlu1 %v1472_v60 }
 0x1f1   : > { %v569_v58 = vpop.permute.xlu0 %568 }
 0x1f2   : > { %v590_v60 = vmul.f32 %v569_v58, %v1770_v40 }
 0x1f3   : > { %v632_v63 = vpop.permute.xlu1 %631 }
 0x1f4   : > { %606 = vst.msk [vmem:[#allocation3 + $0x70] sm:$0xff] %vm443_vm1, %v590_v60  ;;  %v705_v1 = vmul.f32 %v632_v63, %v1722_v4 }
 0x1f6   : > { %v627_v0 = vpop.permute.xlu0 %626  ;;  %738 = vrot.lane.b32.xlu0 %v705_v1, %s1473_s29 }
 0x1f7   : > { %v704_v2 = vmul.f32 %v627_v0, %v1716_v62  ;;  %v637_v5 = vpop.permute.xlu1 %636 }
 0x1f8   : > { %v706_v7 = vmul.f32 %v637_v5, %v1714_v61 }
 0x1f9   : > { %736 = vrot.lane.b32.xlu1 %v704_v2, %s1473_s29 }
 0x1fa   : > { %v642_v6 = vpop.permute.xlu0 %641 }
 0x1fb   : > { %v707_v8 = vmul.f32 %v642_v6, %v1720_v3  ;;  %v647_v11 = vpop.permute.xlu1 %646 }
 0x1fc   : > { %v708_v13 = vmul.f32 %v647_v11, %v1730_v10 }
 0x1fd   : > { %742 = vrot.lane.b32.xlu0 %v707_v8, %s1473_s29  ;;  %740 = vrot.lane.b32.xlu1 %v706_v7, %s1473_s29 }
 0x1fe   : > { %v652_v12 = vpop.permute.xlu0 %651 }
 0x1ff   : > { %v709_v14 = vmul.f32 %v652_v12, %v1728_v9  ;;  %v657_v17 = vpop.permute.xlu1 %656 }
 0x200   : > { %v710_v19 = vmul.f32 %v657_v17, %v1738_v16 }
 0x201   : > { %746 = vrot.lane.b32.xlu0 %v709_v14, %s1473_s29  ;;  %744 = vrot.lane.b32.xlu1 %v708_v13, %s1473_s29 }
 0x202   : > { %v662_v18 = vpop.permute.xlu0 %661 }
 0x203   : > { %v711_v20 = vmul.f32 %v662_v18, %v1736_v15  ;;  %v667_v23 = vpop.permute.xlu1 %666 }
 0x204   : > { %v712_v25 = vmul.f32 %v667_v23, %v1746_v22 }
 0x205   : > { %750 = vrot.lane.b32.xlu0 %v711_v20, %s1473_s29  ;;  %748 = vrot.lane.b32.xlu1 %v710_v19, %s1473_s29 }
 0x206   : > { %v672_v24 = vpop.permute.xlu0 %671 }
 0x207   : > { %v713_v26 = vmul.f32 %v672_v24, %v1744_v21  ;;  %v677_v29 = vpop.permute.xlu1 %676 }
 0x208   : > { %v714_v31 = vmul.f32 %v677_v29, %v1754_v28 }
 0x209   : > { %754 = vrot.lane.b32.xlu0 %v713_v26, %s1473_s29  ;;  %752 = vrot.lane.b32.xlu1 %v712_v25, %s1473_s29 }
 0x20a   : > { %v682_v30 = vpop.permute.xlu0 %681 }
 0x20b   : > { %v715_v32 = vmul.f32 %v682_v30, %v1752_v27  ;;  %v687_v35 = vpop.permute.xlu1 %686 }
 0x20c   : > { %v716_v37 = vmul.f32 %v687_v35, %v1762_v34 }
 0x20d   : > { %758 = vrot.lane.b32.xlu0 %v715_v32, %s1473_s29  ;;  %756 = vrot.lane.b32.xlu1 %v714_v31, %s1473_s29 }
 0x20e   : > { %v692_v36 = vpop.permute.xlu0 %691 }
 0x20f   : > { %v717_v38 = vmul.f32 %v692_v36, %v1760_v33  ;;  %v697_v43 = vpop.permute.xlu1 %696 }
 0x210   : > { %v718_v59 = vmul.f32 %v697_v43, %v1770_v40 }
 0x211   : > { %762 = vrot.lane.b32.xlu0 %v717_v38, %s1473_s29  ;;  %760 = vrot.lane.b32.xlu1 %v716_v37, %s1473_s29 }
 0x212   : > { %v702_v58 = vpop.permute.xlu0 %701 }
 0x213   : > { %v719_v60 = vmul.f32 %v702_v58, %v1768_v39 }
 0x214   : > { %v820_v63 = vpop.permute.xlu1 %819 }
 0x215   : > { %766 = vrot.lane.b32.xlu0 %v719_v60, %s1473_s29  ;;  %764 = vrot.lane.b32.xlu1 %v718_v59, %s1473_s29  ;;  %v897_v1 = vmul.f32 %v820_v63, %v1716_v62 }
 0x217   : > { %v825_v0 = vpop.permute.xlu0 %824 }
 0x218   : > { %v898_v2 = vmul.f32 %v825_v0, %v1722_v4  ;;  %v830_v5 = vpop.permute.xlu1 %829 }
 0x219   : > { %929 = vrot.lane.b32.xlu0 %v897_v1, %s1474_s30 }
 0x21a   : > { %931 = vrot.lane.b32.xlu1 %v898_v2, %s1474_s30 }
 0x21c   : > { %v835_v6 = vpop.permute.xlu1 %834 }
 0x21d   : > { %1012 = vperm.xlu0 %1428, %v1594_v42   ;;  %v840_v42 = vpop.permute.xlu0 %839 }
 0x21e   : > { %1017 = vperm.xlu1 %1429, %v1606_v45  }
 0x221   : > { %1027 = vperm.xlu0 %1428, %v1601_v44   ;;  %v850_v44 = vpop.permute.xlu0 %849 }
 0x222   : > { %1022 = vperm.xlu1 %1429, %v1589_v41   ;;  %v845_v41 = vpop.permute.xlu1 %844 }
 0x225   : > { %1037 = vperm.xlu0 %1428, %v1613_v46   ;;  %v899_v46 = vmul.f32 %v830_v5, %v1714_v61 }
 0x226   : > { %1032 = vperm.xlu1 %1429, %v1618_v47   ;;  %v855_v45 = vpop.permute.xlu1 %854  ;;  %v900_v47 = vmul.f32 %v835_v6, %v1720_v3 }
 0x229   : > { %1047 = vperm.xlu0 %1428, %v1625_v48   ;;  %v860_v48 = vpop.permute.xlu0 %859 }
 0x22a   : > { %1042 = vperm.xlu1 %1429, %v1630_v49   ;;  %v865_v49 = vpop.permute.xlu1 %864 }
 0x22d   : > { %1057 = vperm.xlu0 %1428, %v1637_v50   ;;  %v901_v50 = vmul.f32 %v840_v42, %v1730_v10 }
 0x22e   : > { %1052 = vperm.xlu1 %1429, %v1642_v51   ;;  %v902_v51 = vmul.f32 %v845_v41, %v1728_v9 }
 0x231   : > { %1067 = vperm.xlu0 %1428, %v1649_v52   ;;  %v903_v52 = vmul.f32 %v850_v44, %v1738_v16 }
 0x232   : > { %1062 = vperm.xlu1 %1429, %v1654_v53   ;;  %v904_v53 = vmul.f32 %v855_v45, %v1736_v15 }
 0x235   : > { %1077 = vperm.xlu0 %1428, %v1661_v54   ;;  %v870_v54 = vpop.permute.xlu0 %869 }
 0x236   : > { %1072 = vperm.xlu1 %1429, %v1666_v55   ;;  %v875_v55 = vpop.permute.xlu1 %874  ;;  %v907_v11 = vmul.f32 %v870_v54, %v1754_v28 }
 0x237   : > { %v908_v12 = vmul.f32 %v875_v55, %v1752_v27 }
 0x239   : > { %1087 = vperm.xlu0 %1428, %v1673_v56   ;;  %v905_v56 = vmul.f32 %v860_v48, %v1746_v22  ;;  %v880_v7 = vpop.permute.xlu0 %879 }
 0x23a   : > { %1082 = vperm.xlu1 %1429, %v1678_v57   ;;  %v906_v57 = vmul.f32 %v865_v49, %v1744_v21  ;;  %v885_v8 = vpop.permute.xlu1 %884  ;;  %v909_v13 = vmul.f32 %v880_v7, %v1762_v34 }
 0x23b   : > { %v910_v14 = vmul.f32 %v885_v8, %v1760_v33 }
 0x23d   : > { %935 = vrot.lane.b32.xlu0 %v900_v47, %s1474_s30  ;;  %v890_v17 = vpop.permute.xlu0 %889 }
 0x23e   : > { %933 = vrot.lane.b32.xlu1 %v899_v46, %s1474_s30  ;;  %v895_v18 = vpop.permute.xlu1 %894  ;;  %v911_v19 = vmul.f32 %v890_v17, %v1770_v40 }
 0x23f   : > { %v912_v20 = vmul.f32 %v895_v18, %v1768_v39 }
 0x241   : > { %939 = vrot.lane.b32.xlu0 %v902_v51, %s1474_s30 }
 0x242   : > { %937 = vrot.lane.b32.xlu1 %v901_v50, %s1474_s30 }
 0x245   : > { %943 = vrot.lane.b32.xlu0 %v904_v53, %s1474_s30 }
 0x246   : > { %941 = vrot.lane.b32.xlu1 %v903_v52, %s1474_s30 }
 0x249   : > { %947 = vrot.lane.b32.xlu0 %v906_v57, %s1474_s30 }
 0x24a   : > { %945 = vrot.lane.b32.xlu1 %v905_v56, %s1474_s30 }
 0x24d   : > { %951 = vrot.lane.b32.xlu0 %v908_v12, %s1474_s30 }
 0x24e   : > { %949 = vrot.lane.b32.xlu1 %v907_v11, %s1474_s30 }
 0x251   : > { %955 = vrot.lane.b32.xlu0 %v910_v14, %s1474_s30 }
 0x252   : > { %953 = vrot.lane.b32.xlu1 %v909_v13, %s1474_s30 }
 0x255   : > { %959 = vrot.lane.b32.xlu0 %v912_v20, %s1474_s30 }
 0x256   : > { %957 = vrot.lane.b32.xlu1 %v911_v19, %s1474_s30 }
 0x268   : > { %v739_v23 = vpop.permute.xlu0 %738 }
 0x269   : > { %786 = vst.msk [vmem:[#allocation3 + $0x8] sm:$0xff] %vm784_vm2, %v739_v23 }
 0x26b   : > { %v737_v24 = vpop.permute.xlu1 %736 }
 0x26c   : > { %785 = vst.msk [vmem:[#allocation3] sm:$0xff] %vm784_vm2, %v737_v24 }
 0x26f   : > { %v743_v25 = vpop.permute.xlu0 %742  ;;  %v741_v26 = vpop.permute.xlu1 %740 }
 0x270   : > { %788 = vst.msk [vmem:[#allocation3 + $0x18] sm:$0xff] %vm784_vm2, %v743_v25  ;;  %787 = vst.msk [vmem:[#allocation3 + $0x10] sm:$0xff] %vm784_vm2, %v741_v26 }
 0x273   : > { %v747_v29 = vpop.permute.xlu0 %746  ;;  %v745_v30 = vpop.permute.xlu1 %744 }
 0x274   : > { %790 = vst.msk [vmem:[#allocation3 + $0x28] sm:$0xff] %vm784_vm2, %v747_v29  ;;  %789 = vst.msk [vmem:[#allocation3 + $0x20] sm:$0xff] %vm784_vm2, %v745_v30 }
 0x277   : > { %v751_v31 = vpop.permute.xlu0 %750  ;;  %v749_v32 = vpop.permute.xlu1 %748 }
 0x278   : > { %792 = vst.msk [vmem:[#allocation3 + $0x38] sm:$0xff] %vm784_vm2, %v751_v31  ;;  %791 = vst.msk [vmem:[#allocation3 + $0x30] sm:$0xff] %vm784_vm2, %v749_v32 }
 0x27b   : > { %v755_v35 = vpop.permute.xlu0 %754  ;;  %v753_v36 = vpop.permute.xlu1 %752 }
 0x27c   : > { %794 = vst.msk [vmem:[#allocation3 + $0x48] sm:$0xff] %vm784_vm2, %v755_v35  ;;  %793 = vst.msk [vmem:[#allocation3 + $0x40] sm:$0xff] %vm784_vm2, %v753_v36 }
 0x27f   : > { %v759_v37 = vpop.permute.xlu0 %758  ;;  %v757_v38 = vpop.permute.xlu1 %756 }
 0x280   : > { %796 = vst.msk [vmem:[#allocation3 + $0x58] sm:$0xff] %vm784_vm2, %v759_v37  ;;  %795 = vst.msk [vmem:[#allocation3 + $0x50] sm:$0xff] %vm784_vm2, %v757_v38 }
 0x283   : > { %v763_v43 = vpop.permute.xlu0 %762  ;;  %v761_v58 = vpop.permute.xlu1 %760 }
 0x284   : > { %798 = vst.msk [vmem:[#allocation3 + $0x68] sm:$0xff] %vm784_vm2, %v763_v43  ;;  %797 = vst.msk [vmem:[#allocation3 + $0x60] sm:$0xff] %vm784_vm2, %v761_v58 }
 0x287   : > { %v767_v59 = vpop.permute.xlu0 %766  ;;  %v765_v60 = vpop.permute.xlu1 %764 }
 0x288   : > { %800 = vst.msk [vmem:[#allocation3 + $0x78] sm:$0xff] %vm784_vm2, %v767_v59  ;;  %799 = vst.msk [vmem:[#allocation3 + $0x70] sm:$0xff] %vm784_vm2, %v765_v60 }
 0x28b   : > { %v930_v63 = vpop.permute.xlu0 %929 }
 0x28c   : > { %v932_v0 = vpop.permute.xlu1 %931  ;;  %978 = vst.msk [vmem:[#allocation3] sm:$0xff] %vm977_vm3, %v930_v63 }
 0x28d   : > { %979 = vst.msk [vmem:[#allocation3 + $0x8] sm:$0xff] %vm977_vm3, %v932_v0 }
 0x29c   : > { %v1013_v1 = vpop.permute.xlu0 %1012 }
 0x29d   : > { %v1018_v2 = vpop.permute.xlu1 %1017  ;;  %v1090_v5 = vmul.f32 %v1013_v1, %v1716_v62 }
 0x29e   : > { %v1091_v6 = vmul.f32 %v1018_v2, %v1722_v4 }
 0x29f   : > { %1122 = vrot.lane.b32.xlu1 %v1090_v5, %s1475_s4 }
 0x2a0   : > { %1124 = vrot.lane.b32.xlu0 %v1091_v6, %s1475_s4  ;;  %v1028_v42 = vpop.permute.xlu0 %1027 }
 0x2a1   : > { %v1023_v41 = vpop.permute.xlu1 %1022  ;;  %v1093_v44 = vmul.f32 %v1028_v42, %v1720_v3 }
 0x2a2   : > { %v1092_v45 = vmul.f32 %v1023_v41, %v1714_v61 }
 0x2a4   : > { %1128 = vrot.lane.b32.xlu0 %v1093_v44, %s1475_s4  ;;  %1126 = vrot.lane.b32.xlu1 %v1092_v45, %s1475_s4  ;;  %v1038_v46 = vpop.permute.xlu0 %1037 }
 0x2a5   : > { %v1033_v47 = vpop.permute.xlu1 %1032  ;;  %v1095_v62 = vmul.f32 %v1038_v46, %v1728_v9 }
 0x2a6   : > { %v1094_v4 = vmul.f32 %v1033_v47, %v1730_v10 }
 0x2a8   : > { %1132 = vrot.lane.b32.xlu0 %v1095_v62, %s1475_s4  ;;  %1130 = vrot.lane.b32.xlu1 %v1094_v4, %s1475_s4  ;;  %v1048_v48 = vpop.permute.xlu0 %1047 }
 0x2a9   : > { %v1043_v49 = vpop.permute.xlu1 %1042  ;;  %v1097_v3 = vmul.f32 %v1048_v48, %v1736_v15 }
 0x2aa   : > { %v1096_v61 = vmul.f32 %v1043_v49, %v1738_v16 }
 0x2ac   : > { %1136 = vrot.lane.b32.xlu0 %v1097_v3, %s1475_s4  ;;  %1134 = vrot.lane.b32.xlu1 %v1096_v61, %s1475_s4  ;;  %v1058_v50 = vpop.permute.xlu0 %1057 }
 0x2ad   : > { %v1053_v51 = vpop.permute.xlu1 %1052  ;;  %v1099_v9 = vmul.f32 %v1058_v50, %v1744_v21 }
 0x2ae   : > { %v1098_v10 = vmul.f32 %v1053_v51, %v1746_v22 }
 0x2b0   : > { %1140 = vrot.lane.b32.xlu0 %v1099_v9, %s1475_s4  ;;  %1138 = vrot.lane.b32.xlu1 %v1098_v10, %s1475_s4  ;;  %v1068_v52 = vpop.permute.xlu0 %1067 }
 0x2b1   : > { %v1063_v53 = vpop.permute.xlu1 %1062  ;;  %v1101_v15 = vmul.f32 %v1068_v52, %v1752_v27 }
 0x2b2   : > { %v1100_v16 = vmul.f32 %v1063_v53, %v1754_v28 }
 0x2b4   : > { %1144 = vrot.lane.b32.xlu0 %v1101_v15, %s1475_s4  ;;  %1142 = vrot.lane.b32.xlu1 %v1100_v16, %s1475_s4  ;;  %v1078_v54 = vpop.permute.xlu0 %1077 }
 0x2b5   : > { %v1073_v55 = vpop.permute.xlu1 %1072  ;;  %v1103_v21 = vmul.f32 %v1078_v54, %v1760_v33 }
 0x2b6   : > { %v1102_v22 = vmul.f32 %v1073_v55, %v1762_v34 }
 0x2b8   : > { %1148 = vrot.lane.b32.xlu0 %v1103_v21, %s1475_s4  ;;  %1146 = vrot.lane.b32.xlu1 %v1102_v22, %s1475_s4  ;;  %v1088_v56 = vpop.permute.xlu0 %1087 }
 0x2b9   : > { %v1083_v57 = vpop.permute.xlu1 %1082  ;;  %v1105_v27 = vmul.f32 %v1088_v56, %v1768_v39 }
 0x2ba   : > { %v1104_v28 = vmul.f32 %v1083_v57, %v1770_v40 }
 0x2bc   : > { %1152 = vrot.lane.b32.xlu0 %v1105_v27, %s1475_s4  ;;  %1150 = vrot.lane.b32.xlu1 %v1104_v28, %s1475_s4  ;;  %v936_v7 = vpop.permute.xlu0 %935 }
 0x2bd   : > { %v934_v8 = vpop.permute.xlu1 %933  ;;  %981 = vst.msk [vmem:[#allocation3 + $0x18] sm:$0xff] %vm977_vm3, %v936_v7 }
 0x2be   : > { %980 = vst.msk [vmem:[#allocation3 + $0x10] sm:$0xff] %vm977_vm3, %v934_v8 }
 0x2c0   : > { %v940_v33 = vpop.permute.xlu0 %939 }
 0x2c1   : > { %v938_v34 = vpop.permute.xlu1 %937  ;;  %983 = vst.msk [vmem:[#allocation3 + $0x28] sm:$0xff] %vm977_vm3, %v940_v33 }
 0x2c2   : > { %982 = vst.msk [vmem:[#allocation3 + $0x20] sm:$0xff] %vm977_vm3, %v938_v34 }
 0x2c4   : > { %v944_v11 = vpop.permute.xlu0 %943 }
 0x2c5   : > { %v942_v39 = vpop.permute.xlu1 %941  ;;  %985 = vst.msk [vmem:[#allocation3 + $0x38] sm:$0xff] %vm977_vm3, %v944_v11 }
 0x2c6   : > { %984 = vst.msk [vmem:[#allocation3 + $0x30] sm:$0xff] %vm977_vm3, %v942_v39 }
 0x2c8   : > { %v948_v40 = vpop.permute.xlu0 %947 }
 0x2c9   : > { %v946_v12 = vpop.permute.xlu1 %945  ;;  %987 = vst.msk [vmem:[#allocation3 + $0x48] sm:$0xff] %vm977_vm3, %v948_v40 }
 0x2ca   : > { %986 = vst.msk [vmem:[#allocation3 + $0x40] sm:$0xff] %vm977_vm3, %v946_v12 }
 0x2cc   : > { %v952_v13 = vpop.permute.xlu0 %951 }
 0x2cd   : > { %v950_v14 = vpop.permute.xlu1 %949  ;;  %989 = vst.msk [vmem:[#allocation3 + $0x58] sm:$0xff] %vm977_vm3, %v952_v13 }
 0x2ce   : > { %988 = vst.msk [vmem:[#allocation3 + $0x50] sm:$0xff] %vm977_vm3, %v950_v14 }
 0x2d0   : > { %v956_v17 = vpop.permute.xlu0 %955 }
 0x2d1   : > { %v954_v18 = vpop.permute.xlu1 %953  ;;  %991 = vst.msk [vmem:[#allocation3 + $0x68] sm:$0xff] %vm977_vm3, %v956_v17 }
 0x2d2   : > { %990 = vst.msk [vmem:[#allocation3 + $0x60] sm:$0xff] %vm977_vm3, %v954_v18 }
 0x2d4   : > { %v960_v19 = vpop.permute.xlu0 %959 }
 0x2d5   : > { %v958_v20 = vpop.permute.xlu1 %957  ;;  %993 = vst.msk [vmem:[#allocation3 + $0x78] sm:$0xff] %vm977_vm3, %v960_v19 }
 0x2d6   : > { %992 = vst.msk [vmem:[#allocation3 + $0x70] sm:$0xff] %vm977_vm3, %v958_v20 }
 0x311   : > { %v1123_v24 = vpop.permute.xlu1 %1122 }
 0x312   : > { %v1125_v23 = vpop.permute.xlu0 %1124  ;;  %1171 = vst.msk [vmem:[#allocation3] sm:$0xff] %vm1170_vm4, %v1123_v24 }
 0x313   : > { %1172 = vst.msk [vmem:[#allocation3 + $0x8] sm:$0xff] %vm1170_vm4, %v1125_v23 }
 0x316   : > { %v1129_v25 = vpop.permute.xlu0 %1128  ;;  %v1127_v26 = vpop.permute.xlu1 %1126 }
 0x317   : > { %1174 = vst.msk [vmem:[#allocation3 + $0x18] sm:$0xff] %vm1170_vm4, %v1129_v25  ;;  %1173 = vst.msk [vmem:[#allocation3 + $0x10] sm:$0xff] %vm1170_vm4, %v1127_v26 }
 0x31a   : > { %v1133_v29 = vpop.permute.xlu0 %1132  ;;  %v1131_v30 = vpop.permute.xlu1 %1130 }
 0x31b   : > { %1176 = vst.msk [vmem:[#allocation3 + $0x28] sm:$0xff] %vm1170_vm4, %v1133_v29  ;;  %1175 = vst.msk [vmem:[#allocation3 + $0x20] sm:$0xff] %vm1170_vm4, %v1131_v30 }
 0x31e   : > { %v1137_v31 = vpop.permute.xlu0 %1136  ;;  %v1135_v32 = vpop.permute.xlu1 %1134 }
 0x31f   : > { %1178 = vst.msk [vmem:[#allocation3 + $0x38] sm:$0xff] %vm1170_vm4, %v1137_v31  ;;  %1177 = vst.msk [vmem:[#allocation3 + $0x30] sm:$0xff] %vm1170_vm4, %v1135_v32 }
 0x322   : > { %v1141_v35 = vpop.permute.xlu0 %1140  ;;  %v1139_v36 = vpop.permute.xlu1 %1138 }
 0x323   : > { %1180 = vst.msk [vmem:[#allocation3 + $0x48] sm:$0xff] %vm1170_vm4, %v1141_v35  ;;  %1179 = vst.msk [vmem:[#allocation3 + $0x40] sm:$0xff] %vm1170_vm4, %v1139_v36 }
 0x326   : > { %v1145_v37 = vpop.permute.xlu0 %1144  ;;  %v1143_v38 = vpop.permute.xlu1 %1142 }
 0x327   : > { %1182 = vst.msk [vmem:[#allocation3 + $0x58] sm:$0xff] %vm1170_vm4, %v1145_v37  ;;  %1181 = vst.msk [vmem:[#allocation3 + $0x50] sm:$0xff] %vm1170_vm4, %v1143_v38 }
 0x32a   : > { %v1149_v43 = vpop.permute.xlu0 %1148  ;;  %v1147_v58 = vpop.permute.xlu1 %1146 }
 0x32b   : > { %1184 = vst.msk [vmem:[#allocation3 + $0x68] sm:$0xff] %vm1170_vm4, %v1149_v43  ;;  %1183 = vst.msk [vmem:[#allocation3 + $0x60] sm:$0xff] %vm1170_vm4, %v1147_v58 }
 0x32e   : > { %v1153_v59 = vpop.permute.xlu0 %1152  ;;  %v1151_v60 = vpop.permute.xlu1 %1150 }
 0x32f   : > { %1186 = vst.msk [vmem:[#allocation3 + $0x78] sm:$0xff] %vm1170_vm4, %v1153_v59  ;;  %1185 = vst.msk [vmem:[#allocation3 + $0x70] sm:$0xff] %vm1170_vm4, %v1151_v60 }
 0x330 PF: > { %p1401_p6 = scmp.eq.s32.totalorder %s1505_s13, 1  ;;  %s1476_s5 = smov [#allocation3]  }
 0x331   : > { %s1193_s6 = sshll.u32 %s1476_s5, 4  ;;  %s1194_s6 = int_to_ptr.vmem [resolvable:$true] %s1193_s6 }
 0x332   : > { %s1430_s7 = scalar_lea.vmem %s1194_s6, 2048  ;;  %p1437_p10 = scmp.lt.s32.totalorder %s1194_s6, %s1194_s6 }
 0x333   : > { %p1431_p7 = scmp.ne.s32.totalorder %s1194_s6, %s1430_s7  ;;  %p1438_p11 = scmp.lt.s32.totalorder %s1430_s7, %s1430_s7 }
 0x335   : > { %p1432_p8 = pnand %p1431_p7, %p1401_p6  ;;  %p1439_p12 = por %p1438_p11, %p1437_p10 }
 0x337   : > { %p1433_p9 = pneg %p1432_p8 }
 0x339   : > { %p1440_p13 = pnand %p1439_p12, %p1433_p9 }
 0x33b   : > { %1443 = shalt.err (!%p1440_p13)
}
 0x33c   : > { %s1444_s10 = scalar_lea.hbm %s1967_s3, 2048 }
 0x33d   : > { %p1445_p0 = scmp.ne.s32.totalorder %s1967_s3, %s1444_s10  ;;  %p1450_p3 = scmp.lt.u32.totalorder %s1444_s10, %s1967_s3 }
 0x33f   : > { %p1446_p1 = pnand %p1445_p0, %p1401_p6 }
 0x341   : > { %p1447_p2 = pneg %p1446_p1 }
 0x343   : > { %p1452_p4 = pnand %p1450_p3, %p1447_p2 }
 0x345   : > { %1455 = shalt.err (!%p1452_p4)
}
 0x346   : > { %s1477_s17 = smov 128   ;;  %s1478_s18 = smov 8  }
 0x347   : > { %1398 = dma.vmem_to_hbm [thread:$0]  (%p1401_p6), %s1194_s6, 2048, %s1967_s3, [#allocation4], %s1477_s17, %s1477_s17, %s1478_s18  }
 0x348   : > { %1461 = dma.done.wait (%p1401_p6), [#allocation4], 2048  }
 0x349   : > { %1463 = vsyncadd (%p1401_p6), [#allocation4], 4294965248 }
 0x34a PF: > { %s14_s12 = sadd.s32 1, %s1466_s12  }
 0x34b   : > { %p11_p5 = scmp.ge.s32.totalorder %s14_s12, 4  }
 0x34d   :  { %13 = sbr.rel (!%p11_p5) target bundleno = 1 (0x1), region = 70 }
 0x354   :  { %1209 = vsyncpa [#allocation4], 1 }
 0x355   :  { %1211 = vsyncpa [#allocation4 + $0x1], 1 }

</bundles_post_ra>
